<compile_context>
chip_gen: v5e
topology: v5e:2x2
jax: 0.10.0
libtpu: 0.0.40
codegen_flags: <defaults>
</compile_context>

<pallas_src>
import jax
import jax.numpy as jnp
import numpy as np
from jax.experimental import pallas as pl
from jax.experimental.pallas import tpu as pltpu


def _make_block_kernel(has_scale_shift):
    """Kernel factory: statically specializes the optional scale/shift path."""

    def kernel(*args):
        if has_scale_shift:
            (x_ref, sc_ref, sh_ref, wband_ref, b_ref, g_ref, be_ref,
             msel_ref, mselt_ref, o_ref, xim) = args
        else:
            (x_ref, wband_ref, b_ref, g_ref, be_ref,
             msel_ref, mselt_ref, o_ref, xim) = args
            sc_ref = sh_ref = None

        H, WC = x_ref.shape            # (H, W*Cin) lane-dense input row view
        WCout = o_ref.shape[-1]        # W*Cout lane-dense output row view
        G = mselt_ref.shape[0]         # number of GroupNorm groups
        eps = 1e-5

        # ---- stage x into the (H, 3*WC) im2col scratch ------------------------
        # Lane band [di*WC:(di+1)*WC] holds x[row + di - 1]; only the two halo
        # rows are zeroed (W-direction padding is already folded into wband).
        # The interior is fully overwritten every step, so this is safe under
        # "parallel" batch scheduling (do NOT guard the zeroing on program_id).
        xsrc = x_ref[...]
        zrow = jnp.zeros((1, WC), jnp.float32)
        xim[0:1, 0:WC] = zrow                        # top halo of top tap
        xim[1:H, 0:WC] = xsrc[0:H - 1, :]            # top tap   (x[i-1])
        xim[:, WC:2 * WC] = xsrc                     # center tap (x[i])
        xim[0:H - 1, 2 * WC:3 * WC] = xsrc[1:H, :]   # bottom tap (x[i+1])
        xim[H - 1:H, 2 * WC:3 * WC] = zrow           # bottom halo of bottom tap

        # ---- 3x3 conv (+bias): ONE im2col matmul (K=3*WC, N=WCout) ------------
        h = jnp.dot(xim[...].astype(wband_ref.dtype), wband_ref[...],
                    preferred_element_type=jnp.float32)
        h = h + b_ref[...]                           # (H, W*Cout)

        # ---- GroupNorm stats: single pass, one fused selector matmul ----------
        n_per_group = jnp.float32(H * WCout // G)    # H * W * channels/group
        hh = jnp.concatenate([h, h * h], axis=0)     # (2H, WCout)
        s = jnp.dot(hh, msel_ref[...], preferred_element_type=jnp.float32)  # (2H, G)
        gsum = jnp.sum(s[0:H, :], axis=0, keepdims=True)        # (1, G)
        gsq = jnp.sum(s[H:2 * H, :], axis=0, keepdims=True)     # (1, G)
        mean_g = gsum / n_per_group
        var_g = gsq / n_per_group - mean_g * mean_g  # biased var (PyTorch GN)
        # TODO(synk): single-pass E[x^2]-E[x]^2 in f32 is fine at these scales;
        # switch to a shifted / two-pass variance if production activations
        # develop |mean| >> std (cancellation risk).
        inv_g = jax.lax.rsqrt(var_g + eps)

        # ---- one fused broadcast matmul: per-group stats -> per-lane ----------
        stats_g = jnp.concatenate([mean_g, inv_g], axis=0)      # (2, G)
        stats_c = jnp.dot(stats_g, mselt_ref[...],
                          preferred_element_type=jnp.float32)   # (2, WCout)
        mean_c = stats_c[0:1, :]
        inv_c = stats_c[1:2, :]

        # ---- fused affine: GN(gamma,beta) [then (scale+1, shift)] -------------
        gain = inv_c * g_ref[...]                                # (1, W*Cout)
        if has_scale_shift:
            one_p_scale = 1.0 + sc_ref[...]
            a = gain * one_p_scale
            c = (be_ref[...] - mean_c * gain) * one_p_scale + sh_ref[...]
        else:
            a = gain
            c = be_ref[...] - mean_c * gain
        y = h * a + c

        # ---- SiLU and lane-dense (256-wide) store ------------------------------
        o_ref[...] = (y * jax.nn.sigmoid(y)).astype(o_ref.dtype)

    return kernel


def block_forward(x_nchw, params, scale_shift=None, groups=8,
                  conv_dtype=jnp.bfloat16):
    """Forward of `Block`.  x_nchw: (B, dim, H, W) f32.
    params: proj_w (dim_out, dim, 3, 3) OIHW, proj_b (dim_out,),
            norm_w/norm_b (dim_out,).
    scale_shift: optional (scale, shift), each (B, dim_out) (or (B,dim_out,1,1)).
    conv_dtype: dtype of the MXU conv operands (bf16 default, f32 for exact).
    Returns (B, dim_out, H, W) f32."""
    B, Cin, H, W = x_nchw.shape
    w_oihw = params['proj_w']
    Cout = w_oihw.shape[0]
    assert Cout % groups == 0
    cpg = Cout // groups
    WC, WCout = W * Cin, W * Cout

    # NCHW -> NHWC -> lane-dense (B, H, W*Cin); pure layout plumbing in wrapper.
    x_ld = jnp.transpose(x_nchw, (0, 2, 3, 1)).reshape(B, H, WC).astype(jnp.float32)

    # im2col conv weight: fold the 3 W-direction taps (and the W zero padding)
    # of the 3x3 kernel into a single (3*W*Cin -> W*Cout) matrix; row band
    # [di*WC:(di+1)*WC] matches scratch lane band di (input row offset di-1).
    sel = np.zeros((3, W, W), np.float32)
    for dj in range(3):
        for wo in range(W):
            wi = wo + dj - 1
            if 0 <= wi < W:
                sel[dj, wi, wo] = 1.0
    w_hwio = jnp.transpose(w_oihw, (2, 3, 1, 0)).astype(jnp.float32)
    wband = jnp.einsum('ijco,jpq->ipcqo', w_hwio, jnp.asarray(sel))
    wband = wband.reshape(3 * WC, WCout).astype(conv_dtype)
    # TODO(synk): at production W/C this folded weight grows ~W x; switch to a
    # row-tiled im2col ((tileH*W, 9*Cin) @ (9*Cin, Cout)) with an H halo and
    # pl.Buffered(1) constant operands for the v7x 64 MiB VMEM budget.

    def lane_tile_c(v):                 # (Cout,) -> (1, W*Cout), c fastest
        return jnp.tile(jnp.asarray(v, jnp.float32).reshape(1, Cout), (1, W))

    b_ld = lane_tile_c(params['proj_b'])
    g_ld = lane_tile_c(params['norm_w'])
    be_ld = lane_tile_c(params['norm_b'])

    # channel -> group one-hot, tiled over W (lane order: w major, c minor)
    e = np.kron(np.eye(groups, dtype=np.float32), np.ones((cpg, 1), np.float32))
    msel = jnp.asarray(np.tile(e, (W, 1)))                 # (W*Cout, G)
    mselt = jnp.asarray(np.tile(e, (W, 1)).T)              # (G, W*Cout)

    has_ss = scale_shift is not None

    batch3 = lambda d1, d2: pl.BlockSpec((None, d1, d2), lambda b: (b, 0, 0))
    full2 = lambda d1, d2: pl.BlockSpec((d1, d2), lambda b: (0, 0))

    inputs = [x_ld]
    in_specs = [batch3(H, WC)]
    if has_ss:
        scale, shift = scale_shift
        scale = jnp.asarray(scale, jnp.float32).reshape(B, Cout)
        shift = jnp.asarray(shift, jnp.float32).reshape(B, Cout)
        inputs += [jnp.tile(scale[:, None, :], (1, 1, W)),   # (B, 1, W*Cout)
                   jnp.tile(shift[:, None, :], (1, 1, W))]
        in_specs += [batch3(1, WCout), batch3(1, WCout)]
    inputs += [wband, b_ld, g_ld, be_ld, msel, mselt]
    in_specs += [full2(3 * WC, WCout),                       # im2col conv weight
                 full2(1, WCout), full2(1, WCout), full2(1, WCout),  # b, gamma, beta
                 full2(WCout, groups), full2(groups, WCout)]          # msel, mselT

    out_ld = pl.pallas_call(
        _make_block_kernel(has_ss),
        out_shape=jax.ShapeDtypeStruct((B, H, WCout), jnp.float32),
        grid_spec=pltpu.PrefetchScalarGridSpec(
            num_scalar_prefetch=0,
            grid=(B,),
            in_specs=in_specs,
            out_specs=pl.BlockSpec((None, H, WCout), lambda b: (b, 0, 0)),
            scratch_shapes=[pltpu.VMEM((H, 3 * WC), jnp.float32)],
        ),
        compiler_params=pltpu.CompilerParams(
            dimension_semantics=("parallel",),
            vmem_limit_bytes=32 * 1024 * 1024),
    )(*inputs)

    # lane-dense (B, H, W*Cout) -> NCHW (B, Cout, H, W)
    return jnp.transpose(out_ld.reshape(B, H, W, Cout), (0, 3, 1, 2))


# ---------------- plain-JAX reference (for correctness check) ----------------
def ref_forward(x_nchw, params, scale_shift, groups):
    x = jnp.transpose(x_nchw, (0, 2, 3, 1))
    w = jnp.transpose(params['proj_w'], (2, 3, 1, 0))      # OIHW -> HWIO
    dn = ('NHWC', 'HWIO', 'NHWC')
    h = jax.lax.conv_general_dilated(
        x, w, (1, 1), [(1, 1), (1, 1)], dimension_numbers=dn,
        precision=jax.lax.Precision.HIGHEST) + params['proj_b'].reshape(1, 1, 1, -1)
    B, H, W, Cout = h.shape
    cpg = Cout // groups
    hg = h.reshape(B, H, W, groups, cpg)
    mu = jnp.mean(hg, axis=(1, 2, 4), keepdims=True)
    var = jnp.mean((hg - mu) ** 2, axis=(1, 2, 4), keepdims=True)
    hn = ((hg - mu) * jax.lax.rsqrt(var + 1e-5)).reshape(B, H, W, Cout)
    hn = hn * params['norm_w'].reshape(1, 1, 1, -1) + params['norm_b'].reshape(1, 1, 1, -1)
    if scale_shift is not None:
        sc, sh = scale_shift
        hn = hn * (sc[:, None, None, :] + 1.0) + sh[:, None, None, :]
    out = hn * jax.nn.sigmoid(hn)
    return jnp.transpose(out, (0, 3, 1, 2))


if __name__ == "__main__":
    # module config: dim=4, dim_out=16, groups=8   (2 channels per group)
    B, Cin, H, W = 2, 4, 16, 16
    Cout, groups = 16, 8

    key = jax.random.PRNGKey(0)
    ks = jax.random.split(key, 8)
    rnd = lambda k, s, sc=0.15: (sc * jax.random.normal(k, s)).astype(jnp.float32)

    params = dict(
        proj_w=rnd(ks[0], (Cout, Cin, 3, 3)),
        proj_b=rnd(ks[1], (Cout,)),
        norm_w=(1.0 + rnd(ks[2], (Cout,))).astype(jnp.float32),
        norm_b=rnd(ks[3], (Cout,)),
    )
    x = jax.random.normal(ks[4], (B, Cin, H, W), jnp.float32)
    scale = rnd(ks[5], (B, Cout))
    shift = rnd(ks[6], (B, Cout))

    exp = ref_forward(x, params, (scale, shift), groups)

    # with scale_shift, bf16 MXU operands (default / fast path)
    out_bf16 = jax.block_until_ready(
        block_forward(x, params, (scale, shift), groups=groups))
    np.testing.assert_allclose(np.asarray(out_bf16), np.asarray(exp),
                               rtol=3e-2, atol=3e-2)

    # with scale_shift, f32 MXU operands: exact-math check at tight tolerance
    out_f32 = jax.block_until_ready(
        block_forward(x, params, (scale, shift), groups=groups,
                      conv_dtype=jnp.float32))
    np.testing.assert_allclose(np.asarray(out_f32), np.asarray(exp),
                               rtol=5e-4, atol=5e-4)

    # without scale_shift (specialized kernel variant, module default path)
    out2 = jax.block_until_ready(
        block_forward(x, params, None, groups=groups, conv_dtype=jnp.float32))
    exp2 = ref_forward(x, params, None, groups)
    np.testing.assert_allclose(np.asarray(out2), np.asarray(exp2),
                               rtol=5e-4, atol=5e-4)

    print("KERNEL_OK")
</pallas_src>

<mosaic_0001>
module attributes {stable_mosaic.version = 11 : i64} {
  func.func @kernel(%arg0: i32, %arg1: memref<1x16x64xf32, #tpu.memory_space<vmem>>, %arg2: memref<1x1x256xf32, #tpu.memory_space<vmem>>, %arg3: memref<1x1x256xf32, #tpu.memory_space<vmem>>, %arg4: memref<192x256xbf16, #tpu.memory_space<vmem>>, %arg5: memref<1x256xf32, #tpu.memory_space<vmem>>, %arg6: memref<1x256xf32, #tpu.memory_space<vmem>>, %arg7: memref<1x256xf32, #tpu.memory_space<vmem>>, %arg8: memref<256x8xf32, #tpu.memory_space<vmem>>, %arg9: memref<8x256xf32, #tpu.memory_space<vmem>>, %arg10: memref<1x16x256xf32, #tpu.memory_space<vmem>>, %arg11: memref<16x192xf32, #tpu.memory_space<vmem>>) attributes {dimension_semantics = [#tpu.dimension_semantics<parallel>], iteration_bounds = array<i64: 2>, scalar_prefetch = 0 : i64, scratch_operands = 1 : i64, tpu.core_type = #tpu.core_type<tc>, window_params = [{transform_indices = @transform_0, window_bounds = array<i64: 1, 16, 64>}, {transform_indices = @transform_1, window_bounds = array<i64: 1, 1, 256>}, {transform_indices = @transform_2, window_bounds = array<i64: 1, 1, 256>}, {pipeline_mode = #tpu.pipeline_mode<synchronous>, transform_indices = @transform_3, window_bounds = array<i64: 192, 256>}, {pipeline_mode = #tpu.pipeline_mode<synchronous>, transform_indices = @transform_4, window_bounds = array<i64: 1, 256>}, {pipeline_mode = #tpu.pipeline_mode<synchronous>, transform_indices = @transform_5, window_bounds = array<i64: 1, 256>}, {pipeline_mode = #tpu.pipeline_mode<synchronous>, transform_indices = @transform_6, window_bounds = array<i64: 1, 256>}, {pipeline_mode = #tpu.pipeline_mode<synchronous>, transform_indices = @transform_7, window_bounds = array<i64: 256, 8>}, {pipeline_mode = #tpu.pipeline_mode<synchronous>, transform_indices = @transform_8, window_bounds = array<i64: 8, 256>}, {transform_indices = @transform_9, window_bounds = array<i64: 1, 16, 256>}]} {
    %c0 = arith.constant 0 : index
    %c0_0 = arith.constant 0 : index
    %c0_1 = arith.constant 0 : index
    %0 = vector.load %arg1[%c0, %c0_0, %c0_1] : memref<1x16x64xf32, #tpu.memory_space<vmem>>, vector<1x16x64xf32>
    %1 = vector.shape_cast %0 : vector<1x16x64xf32> to vector<16x64xf32>
    %cst = arith.constant 0.000000e+00 : f32
    %2 = vector.broadcast %cst : f32 to vector<1x64xf32>
    %c0_2 = arith.constant 0 : index
    %c0_3 = arith.constant 0 : index
    %3 = vector.load %arg11[%c0_2, %c0_3] : memref<16x192xf32, #tpu.memory_space<vmem>>, vector<1x64xf32>
    tpu.vector_store %arg11[%c0_2, %c0_3], %2 {strides = array<i32>} : memref<16x192xf32, #tpu.memory_space<vmem>>, vector<1x64xf32>,
    %4 = vector.extract_strided_slice %1 {offsets = [0, 0], sizes = [15, 64], strides = [1, 1]} : vector<16x64xf32> to vector<15x64xf32>
    %c1 = arith.constant 1 : index
    %c0_4 = arith.constant 0 : index
    %5 = vector.load %arg11[%c1, %c0_4] : memref<16x192xf32, #tpu.memory_space<vmem>>, vector<15x64xf32>
    tpu.vector_store %arg11[%c1, %c0_4], %4 {strides = array<i32>} : memref<16x192xf32, #tpu.memory_space<vmem>>, vector<15x64xf32>,
    %c0_5 = arith.constant 0 : index
    %c64 = arith.constant 64 : index
    %6 = vector.load %arg11[%c0_5, %c64] : memref<16x192xf32, #tpu.memory_space<vmem>>, vector<16x64xf32>
    tpu.vector_store %arg11[%c0_5, %c64], %1 {strides = array<i32>} : memref<16x192xf32, #tpu.memory_space<vmem>>, vector<16x64xf32>,
    %7 = vector.extract_strided_slice %1 {offsets = [1, 0], sizes = [15, 64], strides = [1, 1]} : vector<16x64xf32> to vector<15x64xf32>
    %c0_6 = arith.constant 0 : index
    %c128 = arith.constant 128 : index
    %8 = vector.load %arg11[%c0_6, %c128] : memref<16x192xf32, #tpu.memory_space<vmem>>, vector<15x64xf32>
    tpu.vector_store %arg11[%c0_6, %c128], %7 {strides = array<i32>} : memref<16x192xf32, #tpu.memory_space<vmem>>, vector<15x64xf32>,
    %c15 = arith.constant 15 : index
    %c128_7 = arith.constant 128 : index
    %9 = vector.load %arg11[%c15, %c128_7] : memref<16x192xf32, #tpu.memory_space<vmem>>, vector<1x64xf32>
    tpu.vector_store %arg11[%c15, %c128_7], %2 {strides = array<i32>} : memref<16x192xf32, #tpu.memory_space<vmem>>, vector<1x64xf32>,
    %c0_8 = arith.constant 0 : index
    %c0_9 = arith.constant 0 : index
    %10 = vector.load %arg11[%c0_8, %c0_9] : memref<16x192xf32, #tpu.memory_space<vmem>>, vector<16x192xf32>
    %11 = arith.truncf %10 : vector<16x192xf32> to vector<16x192xbf16>
    %c0_10 = arith.constant 0 : index
    %c0_11 = arith.constant 0 : index
    %12 = vector.load %arg4[%c0_10, %c0_11] : memref<192x256xbf16, #tpu.memory_space<vmem>>, vector<192x256xbf16>
    %cst_12 = arith.constant dense<0.000000e+00> : vector<16x256xf32>
    %13 = tpu.matmul %11, %12, %cst_12 {dimension_numbers = #tpu.dot_dimension_numbers<[1], [0], [0], [1], [0, 0, 1, 1], [], []>} : vector<16x192xbf16>, vector<192x256xbf16>, vector<16x256xf32> -> vector<16x256xf32>
    %c0_13 = arith.constant 0 : index
    %c0_14 = arith.constant 0 : index
    %14 = vector.load %arg5[%c0_13, %c0_14] : memref<1x256xf32, #tpu.memory_space<vmem>>, vector<1x256xf32>
    %15 = vector.broadcast %14 : vector<1x256xf32> to vector<16x256xf32>
    %16 = arith.addf %13, %15 : vector<16x256xf32>
    %17 = arith.mulf %16, %16 : vector<16x256xf32>
    %18 = tpu.concatenate %16, %17 in 0 : vector<16x256xf32>, vector<16x256xf32> -> vector<32x256xf32>
    %c0_15 = arith.constant 0 : index
    %c0_16 = arith.constant 0 : index
    %19 = vector.load %arg8[%c0_15, %c0_16] : memref<256x8xf32, #tpu.memory_space<vmem>>, vector<256x8xf32>
    %cst_17 = arith.constant dense<0.000000e+00> : vector<32x8xf32>
    %20 = tpu.matmul %18, %19, %cst_17 {dimension_numbers = #tpu.dot_dimension_numbers<[1], [0], [0], [1], [0, 0, 1, 1], [], []>} : vector<32x256xf32>, vector<256x8xf32>, vector<32x8xf32> -> vector<32x8xf32>
    %21 = vector.extract_strided_slice %20 {offsets = [0, 0], sizes = [16, 8], strides = [1, 1]} : vector<32x8xf32> to vector<16x8xf32>
    %cst_18 = arith.constant dense<0.000000e+00> : vector<8xf32>
    %22 = vector.multi_reduction <add>, %21, %cst_18 [0] : vector<16x8xf32> to vector<8xf32>
    %23 = vector.shape_cast %22 : vector<8xf32> to vector<1x8xf32>
    %24 = vector.extract_strided_slice %20 {offsets = [16, 0], sizes = [16, 8], strides = [1, 1]} : vector<32x8xf32> to vector<16x8xf32>
    %cst_19 = arith.constant dense<0.000000e+00> : vector<8xf32>
    %25 = vector.multi_reduction <add>, %24, %cst_19 [0] : vector<16x8xf32> to vector<8xf32>
    %26 = vector.shape_cast %25 : vector<8xf32> to vector<1x8xf32>
    %cst_20 = arith.constant 5.120000e+02 : f32
    %27 = vector.broadcast %cst_20 : f32 to vector<1x8xf32>
    %28 = arith.divf %23, %27 : vector<1x8xf32>
    %cst_21 = arith.constant 5.120000e+02 : f32
    %29 = vector.broadcast %cst_21 : f32 to vector<1x8xf32>
    %30 = arith.divf %26, %29 : vector<1x8xf32>
    %31 = arith.mulf %28, %28 : vector<1x8xf32>
    %32 = arith.subf %30, %31 : vector<1x8xf32>
    %cst_22 = arith.constant 9.99999974E-6 : f32
    %33 = vector.broadcast %cst_22 : f32 to vector<1x8xf32>
    %34 = arith.addf %32, %33 : vector<1x8xf32>
    %35 = math.rsqrt %34 : vector<1x8xf32>
    %36 = tpu.concatenate %28, %35 in 0 : vector<1x8xf32>, vector<1x8xf32> -> vector<2x8xf32>
    %c0_23 = arith.constant 0 : index
    %c0_24 = arith.constant 0 : index
    %37 = vector.load %arg9[%c0_23, %c0_24] : memref<8x256xf32, #tpu.memory_space<vmem>>, vector<8x256xf32>
    %cst_25 = arith.constant dense<0.000000e+00> : vector<2x256xf32>
    %38 = tpu.matmul %36, %37, %cst_25 {dimension_numbers = #tpu.dot_dimension_numbers<[1], [0], [0], [1], [0, 0, 1, 1], [], []>} : vector<2x8xf32>, vector<8x256xf32>, vector<2x256xf32> -> vector<2x256xf32>
    %39 = vector.extract_strided_slice %38 {offsets = [0, 0], sizes = [1, 256], strides = [1, 1]} : vector<2x256xf32> to vector<1x256xf32>
    %40 = vector.extract_strided_slice %38 {offsets = [1, 0], sizes = [1, 256], strides = [1, 1]} : vector<2x256xf32> to vector<1x256xf32>
    %c0_26 = arith.constant 0 : index
    %c0_27 = arith.constant 0 : index
    %41 = vector.load %arg6[%c0_26, %c0_27] : memref<1x256xf32, #tpu.memory_space<vmem>>, vector<1x256xf32>
    %42 = arith.mulf %40, %41 : vector<1x256xf32>
    %c0_28 = arith.constant 0 : index
    %c0_29 = arith.constant 0 : index
    %c0_30 = arith.constant 0 : index
    %43 = vector.load %arg2[%c0_28, %c0_29, %c0_30] : memref<1x1x256xf32, #tpu.memory_space<vmem>>, vector<1x1x256xf32>
    %44 = vector.shape_cast %43 : vector<1x1x256xf32> to vector<1x256xf32>
    %cst_31 = arith.constant 1.000000e+00 : f32
    %45 = vector.broadcast %cst_31 : f32 to vector<1x256xf32>
    %46 = arith.addf %45, %44 : vector<1x256xf32>
    %47 = arith.mulf %42, %46 : vector<1x256xf32>
    %c0_32 = arith.constant 0 : index
    %c0_33 = arith.constant 0 : index
    %48 = vector.load %arg7[%c0_32, %c0_33] : memref<1x256xf32, #tpu.memory_space<vmem>>, vector<1x256xf32>
    %49 = arith.mulf %39, %42 : vector<1x256xf32>
    %50 = arith.subf %48, %49 : vector<1x256xf32>
    %51 = arith.mulf %50, %46 : vector<1x256xf32>
    %c0_34 = arith.constant 0 : index
    %c0_35 = arith.constant 0 : index
    %c0_36 = arith.constant 0 : index
    %52 = vector.load %arg3[%c0_34, %c0_35, %c0_36] : memref<1x1x256xf32, #tpu.memory_space<vmem>>, vector<1x1x256xf32>
    %53 = vector.shape_cast %52 : vector<1x1x256xf32> to vector<1x256xf32>
    %54 = arith.addf %51, %53 : vector<1x256xf32>
    %55 = vector.broadcast %47 : vector<1x256xf32> to vector<16x256xf32>
    %56 = arith.mulf %16, %55 : vector<16x256xf32>
    %57 = vector.broadcast %54 : vector<1x256xf32> to vector<16x256xf32>
    %58 = arith.addf %56, %57 : vector<16x256xf32>
    %59 = arith.negf %58 : vector<16x256xf32>
    %60 = math.exp %59 : vector<16x256xf32>
    %cst_37 = arith.constant 1.000000e+00 : f32
    %61 = vector.broadcast %cst_37 : f32 to vector<16x256xf32>
    %62 = arith.addf %61, %60 : vector<16x256xf32>
    %63 = arith.divf %61, %62 : vector<16x256xf32>
    %64 = arith.mulf %58, %63 : vector<16x256xf32>
    %c0_38 = arith.constant 0 : index
    %c0_39 = arith.constant 0 : index
    %c0_40 = arith.constant 0 : index
    %65 = vector.load %arg10[%c0_38, %c0_39, %c0_40] : memref<1x16x256xf32, #tpu.memory_space<vmem>>, vector<1x16x256xf32>
    %66 = vector.shape_cast %65 : vector<1x16x256xf32> to vector<16x256xf32>
    %67 = vector.shape_cast %64 : vector<16x256xf32> to vector<1x16x256xf32>
    tpu.vector_store %arg10[%c0_38, %c0_39, %c0_40], %67 {strides = array<i32>} : memref<1x16x256xf32, #tpu.memory_space<vmem>>, vector<1x16x256xf32>,
    return
  }
  func.func @transform_0(%arg0: i32) -> (i32, i32, i32) {
    %c0_i32 = arith.constant 0 : i32
    %c0_i32_0 = arith.constant 0 : i32
    %c0_i32_1 = arith.constant 0 : i32
    return %arg0, %c0_i32, %c0_i32_0 : i32, i32, i32
  }
  func.func @transform_1(%arg0: i32) -> (i32, i32, i32) {
    %c0_i32 = arith.constant 0 : i32
    %c0_i32_0 = arith.constant 0 : i32
    %c0_i32_1 = arith.constant 0 : i32
    return %arg0, %c0_i32, %c0_i32_0 : i32, i32, i32
  }
  func.func @transform_2(%arg0: i32) -> (i32, i32, i32) {
    %c0_i32 = arith.constant 0 : i32
    %c0_i32_0 = arith.constant 0 : i32
    %c0_i32_1 = arith.constant 0 : i32
    return %arg0, %c0_i32, %c0_i32_0 : i32, i32, i32
  }
  func.func @transform_3(%arg0: i32) -> (i32, i32) {
    %c0_i32 = arith.constant 0 : i32
    %c0_i32_0 = arith.constant 0 : i32
    %c0_i32_1 = arith.constant 0 : i32
    return %c0_i32, %c0_i32_0 : i32, i32
  }
  func.func @transform_4(%arg0: i32) -> (i32, i32) {
    %c0_i32 = arith.constant 0 : i32
    %c0_i32_0 = arith.constant 0 : i32
    %c0_i32_1 = arith.constant 0 : i32
    return %c0_i32, %c0_i32_0 : i32, i32
  }
  func.func @transform_5(%arg0: i32) -> (i32, i32) {
    %c0_i32 = arith.constant 0 : i32
    %c0_i32_0 = arith.constant 0 : i32
    %c0_i32_1 = arith.constant 0 : i32
    return %c0_i32, %c0_i32_0 : i32, i32
  }
  func.func @transform_6(%arg0: i32) -> (i32, i32) {
    %c0_i32 = arith.constant 0 : i32
    %c0_i32_0 = arith.constant 0 : i32
    %c0_i32_1 = arith.constant 0 : i32
    return %c0_i32, %c0_i32_0 : i32, i32
  }
  func.func @transform_7(%arg0: i32) -> (i32, i32) {
    %c0_i32 = arith.constant 0 : i32
    %c0_i32_0 = arith.constant 0 : i32
    %c0_i32_1 = arith.constant 0 : i32
    return %c0_i32, %c0_i32_0 : i32, i32
  }
  func.func @transform_8(%arg0: i32) -> (i32, i32) {
    %c0_i32 = arith.constant 0 : i32
    %c0_i32_0 = arith.constant 0 : i32
    %c0_i32_1 = arith.constant 0 : i32
    return %c0_i32, %c0_i32_0 : i32, i32
  }
  func.func @transform_9(%arg0: i32) -> (i32, i32, i32) {
    %c0_i32 = arith.constant 0 : i32
    %c0_i32_0 = arith.constant 0 : i32
    %c0_i32_1 = arith.constant 0 : i32
    return %arg0, %c0_i32, %c0_i32_0 : i32, i32, i32
  }
}

</mosaic_0001>

<bundles_post_ra>
// kernel: tpu_custom_call.1
= control target key start
LH: loop header
LB: loop body
LE: loop exit
PB: predicated region body
PF: predicated region fallthrough
CT: control target
= control target key end

     0   :  { %14 = vsyncpa [#allocation4], 0  ;;  %s1802_s0 = inlined_call_operand.vmem [shape: f32[2,16,64], index: 0, kind: input, shape index: {}]   ;;  %s1803_s1 = inlined_call_operand.vmem [shape: f32[2,1,256], index: 1, kind: input, shape index: {}]   ;;  %s1804_s2 = inlined_call_operand.vmem [shape: f32[2,1,256], index: 2, kind: input, shape index: {}]   ;;  %s1805_s3 = inlined_call_operand.vmem [shape: bf16[192,256], index: 3, kind: input, shape index: {}]   ;;  %s1806_s4 = inlined_call_operand.vmem [shape: f32[1,256], index: 4, kind: input, shape index: {}]   ;;  %s1807_s5 = inlined_call_operand.vmem [shape: f32[1,256], index: 5, kind: input, shape index: {}]   ;;  %s1808_s6 = inlined_call_operand.vmem [shape: f32[1,256], index: 6, kind: input, shape index: {}]   ;;  %s1809_s7 = inlined_call_operand.vmem [shape: f32[256,8], index: 7, kind: input, shape index: {}]   ;;  %s1810_s8 = inlined_call_operand.vmem [shape: f32[8,256], index: 8, kind: input, shape index: {}]   ;;  %s1811_s9 = inlined_call_operand.hbm [shape: f32[2,16,256], index: 9, kind: output, shape index: {}]  }
   0x1   :  { %16 = vsyncpa [#allocation4 + $0x1], 0  ;;  %s1360_s30 = smov 0   ;;  %s1362_s10 = smov 0  }
   0x2   :  { %s1364_s11 = smov 0   ;;  %s1366_s12 = smov 0  }
   0x3 LB: > { %s1381_s13 = sadd.s32 4294967295, %s1303_s12   ;;  %s1033_s14 = sadd.s32 4294967294, %s1303_s12   ;;  %s1303_s12 = sphi %s1366_s12, %s1823_s12   ;;  %s1299_s11 = sphi %s1364_s11, %s1822_s11   ;;  %s1295_s10 = sphi %s1362_s10, %s1821_s10   ;;  %s1291_s30 = sphi %s1360_s30, %s1820_s30  }
   0x4   : > { %s1385_s15 = sadd.s32 1, %s1303_s12   ;;  %s233_s16 = sadd.s32 1, %s1299_s11 }
   0x5   : > { %s230_s17 = ssub.s32 %s1303_s12, %s1385_s15  ;;  %p243_p0 = scmp.ne.s32.totalorder %s1299_s11, %s1295_s10 }
   0x6   : > { %p231_p1 = scmp.eq.s32.totalorder %s230_s17, 0  ;;  %p244_p2 = scmp.eq.s32.totalorder %s1381_s13, 1 }
   0x7   : > { %p249_p3 = scmp.ne.s32.totalorder %s1295_s10, %s1291_s30  ;;  %p250_p4 = scmp.eq.s32.totalorder %s1033_s14, 1 }
   0x8   : > { %s1396_s18 = scalar_select %p231_p1, %s1299_s11, %s233_s16  }
   0x9   : > { %p1398_p5 = por %p244_p2, %p243_p0  ;;  %p1402_p6 = por %p250_p4, %p249_p3 }
   0xa   : > { %1812 = sst [smem:[#allocation6_spill]] %s1396_s18  ;;  %p1036_p7 = scmp.ge.s32.totalorder %s1303_s12, 1 }
   0xb   : > { %p308_p8 = scmp.lt.s32.totalorder %s1303_s12, 3 }
   0xd   : > { %p309_p9 = pnand %p1036_p7, %p308_p8 }
   0xe   : > { %p352_p10 = scmp.lt.s32.totalorder (!%p309_p9), %s1381_s13, 1  ;;  %s349_s23 = sand.u32 (!%p309_p9), 1, %s1295_s10  }
   0xf   : > { %312 = sbr.rel (%p309_p9) target bundleno = 695 (0x2b7), region = 56  ;;  %s1741_s24 = sshll.u32 (!%p309_p9), %s349_s23, 5 }
  0x10   : > { %s351_s18 = scalar_lea.vmem (!%p309_p9), [#allocation3], %s1741_s24  ;;  %s1261_s24 = scalar_lea.hbm (!%p309_p9), %s1811_s9, 64 }
  0x11   : > { %s944_s16 = sshll.u32 (!%p309_p9), %s351_s18, 4  ;;  %s945_s16 = int_to_ptr.vmem [resolvable:$true] %s944_s16 }
  0x14   : > { %vm368_vm0 = vcmask 516096   ;;  %v1100_v0 = vld [vmem:[%s1805_s3 + $0x70] sm:$0xf]  ;;  %v1167_v1 = vld [vmem:[%s1805_s3 + $0x74] sm:$0xf0]  ;;  %s1419_s27 = scalar_select %p352_p10, %s1381_s13, 1 }
  0x15   : > { %v1166_v2 = vld [vmem:[%s1805_s3 + $0x74] sm:$0xf]  ;;  %v1101_v3 = vor.u32 %v1167_v1, %v1100_v0  ;;  %v1102_v4 = vld [vmem:[%s1805_s3 + $0x78] sm:$0xf0]  ;;  %v1092_v5 = vld [vmem:[%s1805_s3 + $0x60] sm:$0xf] }
  0x16   : > { %v1105_v6 = vor.u32 %v1166_v2, %v1102_v4  ;;  %v1165_v7 = vld [vmem:[%s1805_s3 + $0x64] sm:$0xf0]  ;;  %v1164_v8 = vld [vmem:[%s1805_s3 + $0x64] sm:$0xf]  ;;  %v1094_v9 = vld [vmem:[%s1805_s3 + $0x68] sm:$0xf0] }
  0x17   : > { %s1151_s26 = sshll.u32 %s1419_s27, 4  ;;  %560 = vmatpush.bf16.msra.mxu0 %v1101_v3  ;;  %v1093_v10 = vor.u32 %v1165_v7, %v1092_v5  ;;  %v1097_v11 = vor.u32 %v1164_v8, %v1094_v9  ;;  %v1084_v12 = vld [vmem:[%s1805_s3 + $0x50] sm:$0xf]  ;;  %v1163_v13 = vld [vmem:[%s1805_s3 + $0x54] sm:$0xf0]  ;;  %vm378_vm1 = vcmask 523265  }
  0x18   : > { %s356_s14 = scalar_lea.vmem %s1802_s0, %s1151_s26  ;;  %588 = vmatpush.bf16.msra.mxu2 %v1105_v6  ;;  %v1162_v14 = vld [vmem:[%s1805_s3 + $0x54] sm:$0xf]  ;;  %v1086_v16 = vld [vmem:[%s1805_s3 + $0x58] sm:$0xf0]  ;;  %v1305_v17 = vmov 0.0   ;;  %s1306_s26 = smov 64   ;;  %v1085_v22 = vor.u32 %v1163_v13, %v1084_v12 }
  0x19   : > { %v366_v15 = vld [vmem:[%s356_s14] sm:$0xff]  ;;  %369 = vst.msk [vmem:[#allocation2] sm:$0x1] %vm368_vm0, %v1305_v17  ;;  %v367_v20 = vld [vmem:[%s356_s14 + $0x8] sm:$0xff]  ;;  %vm391_vm2 = vcmask 1046528   ;;  %vm398_vm3 = vcmask 522240   ;;  %v1089_v23 = vor.u32 %v1162_v14, %v1086_v16 }
  0x1a   : > { %382 = vrot.lane.b32.xlu0 %v366_v15, %s1306_s26  ;;  %v373_v18 = vrot.slane %v366_v15, 7  ;;  %v392_v19 = vrot.slane %v366_v15, 1  ;;  %v393_v21 = vrot.slane %v367_v20, 1  ;;  %v1076_v24 = vld [vmem:[%s1805_s3 + $0x40] sm:$0xf]  ;;  %v374_v38 = vrot.slane %v367_v20, 7 }
  0x1b   : > { %561 = vmatpush.bf16.msra.mxu0 %v1093_v10  ;;  %v1161_v25 = vld [vmem:[%s1805_s3 + $0x44] sm:$0xf0]  ;;  %v1160_v27 = vld [vmem:[%s1805_s3 + $0x44] sm:$0xf]  ;;  %v1078_v28 = vld [vmem:[%s1805_s3 + $0x48] sm:$0xf0] }
  0x1c   : > { %379 = vst.msk [vmem:[#allocation2] sm:$0xfe] %vm378_vm1, %v373_v18  ;;  %589 = vmatpush.bf16.msra.mxu2 %v1097_v11  ;;  %v394_v26 = vsel %vm391_vm2, %v392_v19, %v393_v21  ;;  %v1077_v29 = vor.u32 %v1161_v25, %v1076_v24  ;;  %v1081_v30 = vor.u32 %v1160_v27, %v1078_v28  ;;  %v1068_v31 = vld [vmem:[%s1805_s3 + $0x30] sm:$0xf]  ;;  %v1159_v32 = vld [vmem:[%s1805_s3 + $0x34] sm:$0xf0] }
  0x1d   : > { %399 = vst.msk [vmem:[#allocation2 + $0x18] sm:$0x7f] %vm398_vm3, %v393_v21  ;;  %v1158_v33 = vld [vmem:[%s1805_s3 + $0x34] sm:$0xf]  ;;  %v1069_v34 = vor.u32 %v1159_v32, %v1068_v31  ;;  %v1070_v35 = vld [vmem:[%s1805_s3 + $0x38] sm:$0xf0] }
  0x1e   : > { %400 = vst.msk [vmem:[#allocation2 + $0x1f] sm:$0x1] %vm368_vm0, %v1305_v17  ;;  %v1060_v36 = vld [vmem:[%s1805_s3 + $0x20] sm:$0xf]  ;;  %v1157_v37 = vld [vmem:[%s1805_s3 + $0x24] sm:$0xf0]  ;;  %v1073_v39 = vor.u32 %v1158_v33, %v1070_v35 }
  0x1f   : > { %562 = vmatpush.bf16.msra.mxu0 %v1085_v22  ;;  %v1156_v40 = vld [vmem:[%s1805_s3 + $0x24] sm:$0xf]  ;;  %v1062_v41 = vld [vmem:[%s1805_s3 + $0x28] sm:$0xf0]  ;;  %vm380_vm4 = vcmask 523264   ;;  %v1061_v42 = vor.u32 %v1157_v37, %v1060_v36  ;;  %vm372_vm5 = vcmask 1040384  }
  0x20   : > { %590 = vmatpush.bf16.msra.mxu2 %v1089_v23  ;;  %397 = vst.msk [vmem:[#allocation2 + $0x8] sm:$0xff] %vm380_vm4, %v394_v26  ;;  %v1065_v43 = vor.u32 %v1156_v40, %v1062_v41  ;;  %v375_v44 = vsel %vm372_vm5, %v373_v18, %v374_v38  ;;  %v1052_v45 = vld [vmem:[%s1805_s3 + $0x10] sm:$0xf]  ;;  %v1155_v46 = vld [vmem:[%s1805_s3 + $0x14] sm:$0xf0]  ;;  %vm388_vm6 = vcmask 1048064  }
  0x21   : > { %381 = vst.msk [vmem:[#allocation2 + $0x10] sm:$0xff] %vm380_vm4, %v375_v44  ;;  %v1154_v47 = vld [vmem:[%s1805_s3 + $0x14] sm:$0xf]  ;;  %v1053_v48 = vor.u32 %v1155_v46, %v1052_v45  ;;  %v1054_v49 = vld [vmem:[%s1805_s3 + $0x18] sm:$0xf0]  ;;  %v633_v21 = vld [vmem:[%s1809_s7 + $0x68] sm:$0xff] }
  0x22   : > { %384 = vrot.lane.b32.xlu0 %v367_v20, %s1306_s26  ;;  %v1044_v50 = vld [vmem:[%s1805_s3] sm:$0xf]  ;;  %v1153_v51 = vld [vmem:[%s1805_s3 + $0x4] sm:$0xf0]  ;;  %v1057_v52 = vor.u32 %v1154_v47, %v1054_v49  ;;  %v1152_v53 = vld [vmem:[%s1805_s3 + $0x4] sm:$0xf] }
  0x23   : > { %563 = vmatpush.bf16.msra.mxu0 %v1077_v29  ;;  %v1046_v54 = vld [vmem:[%s1805_s3 + $0x8] sm:$0xf0]  ;;  %v1045_v55 = vor.u32 %v1153_v51, %v1044_v50  ;;  %v1174_v57 = vld [vmem:[%s1805_s3 + $0xb4] sm:$0xf]  ;;  %v1134_v58 = vld [vmem:[%s1805_s3 + $0xb8] sm:$0xf0] }
  0x24   : > { %591 = vmatpush.bf16.msra.mxu2 %v1081_v30  ;;  %v1049_v56 = vor.u32 %v1152_v53, %v1046_v54  ;;  %v1132_v59 = vld [vmem:[%s1805_s3 + $0xb0] sm:$0xf]  ;;  %v1137_v60 = vor.u32 %v1174_v57, %v1134_v58  ;;  %v1175_v61 = vld [vmem:[%s1805_s3 + $0xb4] sm:$0xf0]  ;;  %v1172_v63 = vld [vmem:[%s1805_s3 + $0xa4] sm:$0xf] }
  0x25   : > { %v1133_v62 = vor.u32 %v1175_v61, %v1132_v59  ;;  %v1126_v0 = vld [vmem:[%s1805_s3 + $0xa8] sm:$0xf0]  ;;  %v1124_v1 = vld [vmem:[%s1805_s3 + $0xa0] sm:$0xf]  ;;  %v1173_v3 = vld [vmem:[%s1805_s3 + $0xa4] sm:$0xf0] }
  0x26   : > { %v1129_v2 = vor.u32 %v1172_v63, %v1126_v0  ;;  %v1125_v4 = vor.u32 %v1173_v3, %v1124_v1  ;;  %v1170_v5 = vld [vmem:[%s1805_s3 + $0x94] sm:$0xf]  ;;  %v1118_v6 = vld [vmem:[%s1805_s3 + $0x98] sm:$0xf0]  ;;  %v1116_v7 = vld [vmem:[%s1805_s3 + $0x90] sm:$0xf] }
  0x27   : > { %564 = vmatpush.bf16.msra.mxu0 %v1069_v34  ;;  %v1171_v8 = vld [vmem:[%s1805_s3 + $0x94] sm:$0xf0]  ;;  %v1121_v9 = vor.u32 %v1170_v5, %v1118_v6  ;;  %v1168_v11 = vld [vmem:[%s1805_s3 + $0x84] sm:$0xf]  ;;  %v1110_v12 = vld [vmem:[%s1805_s3 + $0x88] sm:$0xf0] }
  0x28   : > { %592 = vmatpush.bf16.msra.mxu2 %v1073_v39  ;;  %v1117_v10 = vor.u32 %v1171_v8, %v1116_v7  ;;  %v1108_v13 = vld [vmem:[%s1805_s3 + $0x80] sm:$0xf]  ;;  %v1169_v14 = vld [vmem:[%s1805_s3 + $0x84] sm:$0xf0]  ;;  %v1113_v15 = vor.u32 %v1168_v11, %v1110_v12  ;;  %v635_v18 = vld [vmem:[%s1809_s7 + $0x78] sm:$0xff]  ;;  %vm710_vm7 = vcmask 64512  }
  0x29   : > { %v1109_v16 = vor.u32 %v1169_v14, %v1108_v13  ;;  %v634_v19 = vld [vmem:[%s1809_s7 + $0x70] sm:$0xff]  ;;  %652 = vmatpush.msra.mxu1 %v635_v18  ;;  %v651_v20 = vld [vmem:[%s1809_s7 + $0xf8] sm:$0xff]  ;;  %v649_v23 = vld [vmem:[%s1809_s7 + $0xe8] sm:$0xff]  ;;  %s1040_s25 = sshll.u32 %s1419_s27, 1  ;;  %s932_s27 = scalar_lea.sflag [#allocation4], %s349_s23 }
  0x2a   : > { %681 = vmatpush.msra.mxu3 %v651_v20  ;;  %v650_v22 = vld [vmem:[%s1809_s7 + $0xf0] sm:$0xff]  ;;  %v632_v24 = vld [vmem:[%s1809_s7 + $0x60] sm:$0xff]  ;;  %v631_v26 = vld [vmem:[%s1809_s7 + $0x58] sm:$0xff]  ;;  %s360_s17 = scalar_lea.vmem %s1803_s1, %s1040_s25  ;;  %s364_s22 = scalar_lea.vmem %s1804_s2, %s1040_s25 }
  0x2b   : > { %565 = vmatpush.bf16.msra.mxu0 %v1061_v42  ;;  %653 = vmatpush.msra.mxu1 %v634_v19  ;;  %v630_v27 = vld [vmem:[%s1809_s7 + $0x50] sm:$0xff]  ;;  %v402_v31 = vld [vmem:[#allocation2 + $0x8] sm:$0xff]  ;;  %v404_v32 = vld [vmem:[#allocation2 + $0x18] sm:$0xff]  ;;  %s1176_s25 = sshll.u32 %s1381_s13, 5 }
  0x2c   : > { %593 = vmatpush.bf16.msra.mxu2 %v1065_v43  ;;  %682 = vmatpush.msra.mxu3 %v650_v22  ;;  %v406_v33 = vpack.c.bf16 %v404_v32, %v402_v31  ;;  %v629_v34 = vld [vmem:[%s1809_s7 + $0x48] sm:$0xff]  ;;  %v648_v35 = vld [vmem:[%s1809_s7 + $0xe0] sm:$0xff]  ;;  %v647_v37 = vld [vmem:[%s1809_s7 + $0xd8] sm:$0xff]  ;;  %s1756_s29 = scalar_lea.hbm %s1811_s9, %s1176_s25 }
  0x2d   : > { %654 = vmatpush.msra.mxu1 %v633_v21  ;;  %v628_v36 = vld [vmem:[%s1809_s7 + $0x40] sm:$0xff]  ;;  %v627_v38 = vld [vmem:[%s1809_s7 + $0x38] sm:$0xff]  ;;  %v646_v39 = vld [vmem:[%s1809_s7 + $0xd0] sm:$0xff] }
  0x2e   : > { %683 = vmatpush.msra.mxu3 %v649_v23  ;;  %v626_v40 = vld [vmem:[%s1809_s7 + $0x30] sm:$0xff]  ;;  %v645_v41 = vld [vmem:[%s1809_s7 + $0xc8] sm:$0xff]  ;;  %v644_v43 = vld [vmem:[%s1809_s7 + $0xc0] sm:$0xff] }
  0x2f   : > { %566 = vmatpush.bf16.msra.mxu0 %v1053_v48  ;;  %655 = vmatpush.msra.mxu1 %v632_v24  ;;  %v625_v42 = vld [vmem:[%s1809_s7 + $0x28] sm:$0xff]  ;;  %v624_v44 = vld [vmem:[%s1809_s7 + $0x20] sm:$0xff]  ;;  %v643_v45 = vld [vmem:[%s1809_s7 + $0xb8] sm:$0xff]  ;;  %v1307_v24 = vmov 512.0  }
  0x30   : > { %594 = vmatpush.bf16.msra.mxu2 %v1057_v52  ;;  %684 = vmatpush.msra.mxu3 %v648_v35  ;;  %v623_v46 = vld [vmem:[%s1809_s7 + $0x18] sm:$0xff]  ;;  %v642_v47 = vld [vmem:[%s1809_s7 + $0xb0] sm:$0xff]  ;;  %v641_v49 = vld [vmem:[%s1809_s7 + $0xa8] sm:$0xff]  ;;  %1221 = vrcp.f32 %v1307_v24 }
  0x31   : > { %656 = vmatpush.msra.mxu1 %v631_v26  ;;  %v622_v48 = vld [vmem:[%s1809_s7 + $0x10] sm:$0xff]  ;;  %v621_v50 = vld [vmem:[%s1809_s7 + $0x8] sm:$0xff]  ;;  %v640_v51 = vld [vmem:[%s1809_s7 + $0xa0] sm:$0xff] }
  0x32   : > { %685 = vmatpush.msra.mxu3 %v647_v37  ;;  %v620_v52 = vld [vmem:[%s1809_s7] sm:$0xff]  ;;  %v639_v53 = vld [vmem:[%s1809_s7 + $0x98] sm:$0xff]  ;;  %v638_v54 = vld [vmem:[%s1809_s7 + $0x90] sm:$0xff] }
  0x33   : > { %567 = vmatpush.bf16.msra.mxu0 %v1045_v55  ;;  %657 = vmatpush.msra.mxu1 %v630_v27  ;;  %v637_v55 = vld [vmem:[%s1809_s7 + $0x88] sm:$0xff]  ;;  %v431_v59 = vld [vmem:[%s1806_s4] sm:$0x3] }
  0x34   : > { %595 = vmatpush.bf16.msra.mxu2 %v1049_v56  ;;  %686 = vmatpush.msra.mxu3 %v646_v39  ;;  %v636_v56 = vld [vmem:[%s1809_s7 + $0x80] sm:$0xff]  ;;  %v433_v61 = vperm.slane %v431_v59, 0  ;;  %v434_v1 = vperm.slane %v431_v59, 1  ;;  %v753_v21 = vld [vmem:[%s1810_s8 + $0x8] sm:$0xff] }
  0x35   : > { %658 = vmatpush.msra.mxu1 %v629_v34  ;;  %v752_v22 = vld [vmem:[%s1810_s8] sm:$0xff] }
  0x36   : > { %687 = vmatpush.msra.mxu3 %v645_v41  ;;  %v814_v24 = vld [vmem:[%s1808_s6] sm:$0x3] }
  0x37   : > { %578 = vmatpush.bf16.msrb.mxu0 %v1133_v62  ;;  %659 = vmatpush.msra.mxu1 %v628_v36 }
  0x38   : > { %606 = vmatpush.bf16.msrb.mxu2 %v1137_v60  ;;  %688 = vmatpush.msra.mxu3 %v644_v43 }
  0x39   : > { %660 = vmatpush.msra.mxu1 %v627_v38 }
  0x3a   : > { %689 = vmatpush.msra.mxu3 %v643_v45 }
  0x3b   : > { %579 = vmatpush.bf16.msrb.mxu0 %v1125_v4  ;;  %661 = vmatpush.msra.mxu1 %v626_v40 }
  0x3c   : > { %607 = vmatpush.bf16.msrb.mxu2 %v1129_v2  ;;  %690 = vmatpush.msra.mxu3 %v642_v47 }
  0x3d   : > { %662 = vmatpush.msra.mxu1 %v625_v42 }
  0x3e   : > { %691 = vmatpush.msra.mxu3 %v641_v49 }
  0x3f   : > { %580 = vmatpush.bf16.msrb.mxu0 %v1117_v10  ;;  %663 = vmatpush.msra.mxu1 %v624_v44 }
  0x40   : > { %608 = vmatpush.bf16.msrb.mxu2 %v1121_v9  ;;  %692 = vmatpush.msra.mxu3 %v640_v51 }
  0x41   : > { %664 = vmatpush.msra.mxu1 %v623_v46 }
  0x42   : > { %693 = vmatpush.msra.mxu3 %v639_v53 }
  0x43   : > { %581 = vmatpush.bf16.msrb.mxu0 %v1109_v16  ;;  %665 = vmatpush.msra.mxu1 %v622_v48 }
  0x44   : > { %609 = vmatpush.bf16.msrb.mxu2 %v1113_v15  ;;  %694 = vmatpush.msra.mxu3 %v638_v54 }
  0x45   : > { %666 = vmatpush.msra.mxu1 %v621_v50 }
  0x46   : > { %695 = vmatpush.msra.mxu3 %v637_v55 }
  0x47   : > { %667 = vmatpush.msra.mxu1 %v620_v52 }
  0x48   : > { %696 = vmatpush.msra.mxu3 %v636_v56 }
  0x8c   : > { %v383_v17 = vpop.permute.xlu0 %382 }
  0x8d   : > { %389 = vst.msk [vmem:[#allocation2] sm:$0xff] %vm388_vm6, %v383_v17 }
  0x94   : > { %v385_v25 = vpop.permute.xlu0 %384  ;;  %v401_v28 = vld [vmem:[#allocation2] sm:$0xff] }
  0x95   : > { %390 = vst.msk [vmem:[#allocation2 + $0x10] sm:$0xff] %vm388_vm6, %v385_v25 }
  0x9c   : > { %v403_v29 = vld [vmem:[#allocation2 + $0x10] sm:$0xff] }
  0x9d   : > { %v405_v30 = vpack.c.bf16 %v403_v29, %v401_v28 }
  0x9f   : > { %568 = vmatmul.bf16.vlgmr.msra.gmra.mxu0 %v405_v30  ;;  %596 = vmatmul.bf16.vlgmr.msra.gmra.mxu2 %v405_v30  ;;  %v1222_v30 = vpop.eup %1221 }
  0xa0   : > { %792 = vmatpush.msra.mxu2 %v753_v21  ;;  %772 = vmatpush.msra.mxu0 %v752_v22  ;;  %vm734_vm8 = vweird.f32 %v1222_v30 }
  0xaf   : > { %1138 = vmatmul.msk.bf16.vlgmr.msrb.gmra.mxu0 %vm380_vm4, %v406_v33  ;;  %1139 = vmatmul.msk.bf16.vlgmr.msrb.gmra.mxu2 %vm380_vm4, %v406_v33  ;;  %v730_v33 = vmul.f32 512.0, %v1222_v30 }
  0xb1   : > { %v731_v36 = vsub.f32 1.0, %v730_v33 }
  0xb3   : > { %v732_v43 = vmul.f32 %v1222_v30, %v731_v36 }
  0xb5   : > { %v733_v47 = vadd.f32 %v1222_v30, %v732_v43 }
  0xb7   : > { %v735_v51 = vsel %vm734_vm8, %v1222_v30, %v733_v47 }
 0x11c   : > { %v569_v57 = vpop.f32.mrf.mxu0 }
 0x11d   : > { %v570_v63 = vadd.f32 %v569_v57, %v433_v61 }
 0x122   : > { %v597_v58 = vpop.f32.mrf.mxu2 }
 0x123   : > { %v598_v3 = vadd.f32 %v597_v58, %v434_v1 }
 0x124   : > { %v571_v60 = vpop.f32.mrf.mxu0 }
 0x125   : > { %v572_v5 = vadd.f32 %v571_v60, %v433_v61 }
 0x12a   : > { %v599_v62 = vpop.f32.mrf.mxu2 }
 0x12b   : > { %v600_v9 = vadd.f32 %v599_v62, %v434_v1 }
 0x12c   : > { %v583_v0 = vpop.f32.mrf.mxu0 }
 0x12d   : > { %v1668_v2 = vadd.f32 %v583_v0, %v570_v63 }
 0x12f   : > { %668 = vmatmul.f32.vlgmr.msra.gmra.mxu1 %v1668_v2  ;;  %v616_v12 = vmul.f32 %v1668_v2, %v1668_v2 }
 0x132   : > { %v611_v4 = vpop.f32.mrf.mxu2 }
 0x133   : > { %v1671_v6 = vadd.f32 %v611_v4, %v598_v3 }
 0x134   : > { %v585_v7 = vpop.f32.mrf.mxu0 }
 0x135   : > { %v1673_v8 = vadd.f32 %v585_v7, %v572_v5  ;;  %697 = vmatmul.f32.vlgmr.msra.gmra.mxu3 %v1671_v6  ;;  %v617_v13 = vmul.f32 %v1671_v6, %v1671_v6  ;;  %v797_v5 = vld [vmem:[%s1807_s5] sm:$0x3] }
 0x136   : > { %v799_v7 = vperm.slane %v797_v5, 0 }
 0x137   : > { %671 = vmatmul.f32.gmra.mxu1 %v1673_v8  ;;  %v618_v14 = vmul.f32 %v1673_v8, %v1673_v8 }
 0x13a   : > { %v613_v10 = vpop.f32.mrf.mxu2 }
 0x13b   : > { %v1677_v11 = vadd.f32 %v613_v10, %v600_v9  ;;  %v805_v9 = vld [vmem:[%s360_s17] sm:$0x3]  ;;  %s946_s17 = sshll.u32 %s1756_s29, 4  ;;  %s947_s17 = int_to_ptr.hbm [resolvable:$true] %s946_s17 }
 0x13c   : > { %s1255_s26 = sshra.s32 %s947_s17, 4  ;;  %s1256_s26 = int_to_ptr.hbm [resolvable:$true] %s1255_s26 }
 0x13d   : > { %700 = vmatmul.f32.gmra.mxu3 %v1677_v11  ;;  %v619_v15 = vmul.f32 %v1677_v11, %v1677_v11  ;;  %s1257_s14 = scalar_lea.hbm %s1256_s26, 32  ;;  %p1262_p0 = scmp.lt.s32.totalorder %s1256_s26, %s1811_s9 }
 0x13e   : > { %p1258_p11 = scmp.ne.s32.totalorder %s1256_s26, %s1257_s14  ;;  %p1263_p1 = scmp.lt.s32.totalorder %s1261_s24, %s1257_s14 }
 0x13f   : > { %674 = vmatmul.f32.gmra.mxu1 %v616_v12  ;;  %v800_v12 = vperm.slane %v797_v5, 1 }
 0x140   : > { %p1259_p12 = pnand %p1258_p11, %p1398_p5  ;;  %p1264_p2 = por %p1263_p1, %p1262_p0 }
 0x142   : > { %p1260_p13 = pneg %p1259_p12 }
 0x144   : > { %p1265_p3 = pnand %p1264_p2, %p1260_p13 }
 0x145   : > { %703 = vmatmul.f32.gmra.mxu3 %v617_v13  ;;  %v806_v13 = vadd.f32 1.0, %v805_v9 }
 0x147   : > { %677 = vmatmul.f32.gmra.mxu1 %v618_v14 }
 0x14d   : > { %706 = vmatmul.f32.gmra.mxu3 %v619_v15 }
 0x1ac   : > { %v669_v16 = vpop.f32.mrf.mxu1 }
 0x1b4   : > { %v672_v18 = vpop.f32.mrf.mxu1 }
 0x1b8   : > { %v698_v17 = vpop.f32.mrf.mxu3 }
 0x1b9   : > { %v699_v19 = vadd.f32 %v698_v17, %v669_v16  ;;  %v808_v17 = vperm.slane %v806_v13, 0 }
 0x1bb   : > { %v711_v25 = vsel %vm710_vm7, %v699_v19, 0.0 }
 0x1bc   : > { %v675_v28 = vpop.f32.mrf.mxu1 }
 0x1c0   : > { %v701_v20 = vpop.f32.mrf.mxu3 }
 0x1c1   : > { %v702_v23 = vadd.f32 %v701_v20, %v672_v18  ;;  %v809_v20 = vperm.slane %v806_v13, 1 }
 0x1c3   : > { %v712_v26 = vsel %vm710_vm7, %v702_v23, 0.0 }
 0x1c4   : > { %v713_v27 = vadd.f32 %v712_v26, %v711_v25  ;;  %v678_v37 = vpop.f32.mrf.mxu1 }
 0x1c6   : > { %v714_v29 = vrot.slane %v713_v27, 4 }
 0x1c8   : > { %v704_v31 = vpop.f32.mrf.mxu3  ;;  %v715_v32 = vadd.f32 %v714_v29, %v713_v27  ;;  %v830_v29 = vld [vmem:[%s364_s22] sm:$0x3] }
 0x1c9   : > { %v705_v35 = vadd.f32 %v704_v31, %v675_v28 }
 0x1ca   : > { %v716_v34 = vrot.slane %v715_v32, 2 }
 0x1cb   : > { %v720_v41 = vsel %vm710_vm7, %v705_v35, 0.0 }
 0x1cc   : > { %v717_v40 = vadd.f32 %v716_v34, %v715_v32 }
 0x1ce   : > { %v718_v45 = vrot.slane %v717_v40, 1 }
 0x1d0   : > { %v707_v38 = vpop.f32.mrf.mxu3  ;;  %v719_v49 = vadd.f32 %v718_v45, %v717_v40 }
 0x1d1   : > { %v708_v39 = vadd.f32 %v707_v38, %v678_v37 }
 0x1d2   : > { %v736_v54 = vmul.f32 %v735_v51, %v719_v49 }
 0x1d3   : > { %v721_v42 = vsel %vm710_vm7, %v708_v39, 0.0 }
 0x1d4   : > { %v722_v44 = vadd.f32 %v721_v42, %v720_v41  ;;  %v738_v57 = vmul.f32 %v736_v54, %v736_v54 }
 0x1d6   : > { %v723_v46 = vrot.slane %v722_v44, 4 }
 0x1d8   : > { %v724_v48 = vadd.f32 %v723_v46, %v722_v44 }
 0x1da   : > { %v725_v50 = vrot.slane %v724_v48, 2 }
 0x1dc   : > { %v726_v52 = vadd.f32 %v725_v50, %v724_v48 }
 0x1de   : > { %v727_v53 = vrot.slane %v726_v52, 1 }
 0x1e0   : > { %v728_v55 = vadd.f32 %v727_v53, %v726_v52 }
 0x1e2   : > { %v737_v56 = vmul.f32 %v735_v51, %v728_v55 }
 0x1e4   : > { %v739_v58 = vsub.f32 %v737_v56, %v738_v57 }
 0x1e6   : > { %v740_v59 = vadd.f32 1e-05, %v739_v58 }
 0x1e8   : > { %1223 = vrsqrt.f32 %v740_v59  ;;  %vm747_vm10 = vweird.f32 %v740_v59 }
 0x1ee   : > { %v1224_v60 = vpop.eup %1223 }
 0x1ef   : > { %v742_v61 = vmul.f32 %v1224_v60, %v740_v59  ;;  %vm748_vm9 = vweird.f32 %v1224_v60 }
 0x1f0   : > { %vm749_vm11 = vmor %vm747_vm10, %vm748_vm9 }
 0x1f1   : > { %v743_v62 = vmul.f32 %v1224_v60, %v742_v61 }
 0x1f3   : > { %v744_v63 = vmul.f32 0.5, %v743_v62 }
 0x1f5   : > { %v745_v0 = vsub.f32 1.5, %v744_v63 }
 0x1f7   : > { %v746_v1 = vmul.f32 %v1224_v60, %v745_v0 }
 0x1f9   : > { %v750_v3 = vsel %vm749_vm11, %v1224_v60, %v746_v1 }
 0x1fa   : > { %v751_v4 = vsel %vm372_vm5, %v736_v54, %v750_v3 }
 0x1fb   : > { %1140 = vmatmul.msk.f32.vlgmr.msra.gmra.mxu0 %vm710_vm7, %v751_v4  ;;  %1141 = vmatmul.msk.f32.vlgmr.msra.gmra.mxu2 %vm710_vm7, %v751_v4 }
 0x278   : > { %v774_v10 = vpop.f32.mrf.mxu0 }
 0x279   : > { %v803_v14 = vmul.f32 %v799_v7, %v774_v10 }
 0x27b   : > { %v817_v18 = vrot.slane %v803_v14, 1  ;;  %v812_v22 = vmul.f32 %v808_v17, %v803_v14 }
 0x27d   : > { %v821_v23 = vmul.f32 %v817_v18, %v774_v10  ;;  %v832_v30 = vperm.slane %v812_v22, 1 }
 0x27e   : > { %v794_v15 = vpop.f32.mrf.mxu2 }
 0x27f   : > { %v804_v16 = vmul.f32 %v800_v12, %v794_v15  ;;  %v834_v34 = vmul.f32 %v832_v30, %v1668_v2  ;;  %v836_v35 = vmul.f32 %v832_v30, %v1673_v8 }
 0x281   : > { %v818_v19 = vrot.slane %v804_v16, 1  ;;  %v813_v26 = vmul.f32 %v809_v20, %v804_v16 }
 0x283   : > { %v822_v21 = vmul.f32 %v818_v19, %v794_v15  ;;  %v833_v32 = vperm.slane %v813_v26, 1 }
 0x285   : > { %v825_v25 = vrot.slane %v822_v21, 7  ;;  %v835_v36 = vmul.f32 %v833_v32, %v1671_v6  ;;  %v837_v37 = vmul.f32 %v833_v32, %v1677_v11 }
 0x287   : > { %v826_v27 = vsel %vm372_vm5, %v821_v23, %v825_v25 }
 0x288   : > { %v828_v28 = vsub.f32 %v814_v24, %v826_v27 }
 0x28a   : > { %v829_v31 = vmul.f32 %v828_v28, %v806_v13 }
 0x28c   : > { %v831_v33 = vadd.f32 %v830_v29, %v829_v31 }
 0x28e   : > { %v839_v38 = vperm.slane %v831_v33, 0  ;;  %v840_v39 = vperm.slane %v831_v33, 1 }
 0x290   : > { %v1719_v40 = vadd.f32 %v839_v38, %v834_v34  ;;  %v1721_v41 = vadd.f32 %v840_v39, %v835_v36  ;;  %v1723_v42 = vadd.f32 %v839_v38, %v836_v35  ;;  %v1725_v43 = vadd.f32 %v840_v39, %v837_v37 }
 0x292   : > { %v1142_v44 = vmul.f32 -1.442695, %v1719_v40  ;;  %v1143_v2 = vmul.f32 -1.442695, %v1721_v41  ;;  %v1144_v8 = vmul.f32 -1.442695, %v1723_v42 }
 0x293   : > { %v1145_v6 = vmul.f32 -1.442695, %v1725_v43 }
 0x294   : > { %1225 = vpow2.f32 %v1142_v44 }
 0x295   : > { %1227 = vpow2.f32 %v1143_v2 }
 0x296   : > { %1229 = vpow2.f32 %v1144_v8 }
 0x297   : > { %1231 = vpow2.f32 %v1145_v6 }
 0x29a   : > { %v1226_v11 = vpop.eup %1225 }
 0x29b   : > { %v1228_v45 = vpop.eup %1227  ;;  %v859_v46 = vadd.f32 1.0, %v1226_v11 }
 0x29c   : > { %v1230_v47 = vpop.eup %1229  ;;  %v860_v48 = vadd.f32 1.0, %v1228_v45 }
 0x29d   : > { %v1232_v49 = vpop.eup %1231  ;;  %v861_v50 = vadd.f32 1.0, %v1230_v47  ;;  %1233 = vrcp.f32 %v859_v46  ;;  %v872_v52 = vand.u32 2147483647, %v859_v46  ;;  %v874_v53 = vand.u32 2147483648, %v859_v46 }
 0x29e   : > { %v1731_v51 = vadd.f32 1.0, %v1232_v49  ;;  %1235 = vrcp.f32 %v860_v48  ;;  %vm868_vm12 = vweird.f32 %v859_v46  ;;  %vm883_vm13 = vweird.f32 %v860_v48 }
 0x29f   : > { %1237 = vrcp.f32 %v861_v50  ;;  %v887_v59 = vand.u32 2147483647, %v860_v48  ;;  %v889_v60 = vand.u32 2147483648, %v860_v48  ;;  %vm1735_vm14 = vcmp.eq.f32.partialorder %v872_v52, 8.507059e+37 }
 0x2a0   : > { %1239 = vrcp.f32 %v1731_v51  ;;  %v875_v63 = vor.u32 1.1754944e-38, %v874_v53  ;;  %vm898_vm15 = vweird.f32 %v861_v50  ;;  %v902_v4 = vand.u32 2147483647, %v861_v50 }
 0x2a1   : > { %v904_v5 = vand.u32 2147483648, %v861_v50  ;;  %vm1745_vm2 = vcmp.eq.f32.partialorder %v887_v59, 8.507059e+37  ;;  %v890_v14 = vor.u32 1.1754944e-38, %v889_v60  ;;  %vm913_vm5 = vweird.f32 %v1731_v51 }
 0x2a2   : > { %v917_v19 = vand.u32 2147483647, %v1731_v51  ;;  %v919_v20 = vand.u32 2147483648, %v1731_v51  ;;  %vm903_vm9 = vcmp.eq.f32.partialorder %v902_v4, 8.507059e+37 }
 0x2a3   : > { %v1234_v54 = vpop.eup %1233  ;;  %v905_v26 = vor.u32 1.1754944e-38, %v904_v5 }
 0x2a4   : > { %v1236_v55 = vpop.eup %1235  ;;  %v864_v56 = vmul.f32 %v1234_v54, %v859_v46  ;;  %vm869_vm0 = vweird.f32 %v1234_v54  ;;  %v920_v32 = vor.u32 1.1754944e-38, %v919_v20  ;;  %vm918_vm11 = vcmp.eq.f32.partialorder %v917_v19, 8.507059e+37 }
 0x2a5   : > { %v1238_v57 = vpop.eup %1237  ;;  %v879_v58 = vmul.f32 %v1236_v55, %v860_v48  ;;  %vm884_vm1 = vweird.f32 %v1236_v55  ;;  %vm870_vm4 = vmor %vm868_vm12, %vm869_vm0 }
 0x2a6   : > { %v865_v61 = vsub.f32 1.0, %v864_v56  ;;  %v894_v0 = vmul.f32 %v1238_v57, %v861_v50  ;;  %v1240_v1 = vpop.eup %1239  ;;  %vm899_vm3 = vweird.f32 %v1238_v57  ;;  %vm885_vm6 = vmor %vm883_vm13, %vm884_vm1 }
 0x2a7   : > { %v880_v3 = vsub.f32 1.0, %v879_v58  ;;  %v909_v10 = vmul.f32 %v1240_v1, %v1731_v51  ;;  %vm914_vm7 = vweird.f32 %v1240_v1  ;;  %vm900_vm8 = vmor %vm898_vm15, %vm899_vm3 }
 0x2a8   : > { %v866_v7 = vmul.f32 %v1234_v54, %v865_v61  ;;  %v895_v9 = vsub.f32 1.0, %v894_v0  ;;  %vm915_vm10 = vmor %vm913_vm5, %vm914_vm7 }
 0x2a9   : > { %v881_v12 = vmul.f32 %v1236_v55, %v880_v3  ;;  %v910_v17 = vsub.f32 1.0, %v909_v10 }
 0x2aa   : > { %v867_v15 = vadd.f32 %v1234_v54, %v866_v7  ;;  %v896_v16 = vmul.f32 %v1238_v57, %v895_v9 }
 0x2ab   : > { %v882_v18 = vadd.f32 %v1236_v55, %v881_v12  ;;  %v911_v23 = vmul.f32 %v1240_v1, %v910_v17 }
 0x2ac   : > { %v871_v21 = vsel %vm870_vm4, %v1234_v54, %v867_v15  ;;  %v897_v22 = vadd.f32 %v1238_v57, %v896_v16 }
 0x2ad   : > { %v876_v24 = vsel %vm1735_vm14, %v875_v63, %v871_v21  ;;  %v886_v25 = vsel %vm885_vm6, %v1236_v55, %v882_v18  ;;  %v912_v29 = vadd.f32 %v1240_v1, %v911_v23 }
 0x2ae   : > { %v891_v27 = vsel %vm1745_vm2, %v890_v14, %v886_v25  ;;  %v901_v28 = vsel %vm900_vm8, %v1238_v57, %v897_v22  ;;  %v923_v30 = vmul.f32 %v876_v24, %v1719_v40 }
 0x2af   : > { %v906_v31 = vsel %vm903_vm9, %v905_v26, %v901_v28  ;;  %v924_v33 = vmul.f32 %v891_v27, %v1721_v41  ;;  %v916_v34 = vsel %vm915_vm10, %v1240_v1, %v912_v29 }
 0x2b0   : > { %v925_v35 = vmul.f32 %v906_v31, %v1723_v42  ;;  %927 = vst [vmem:[%s351_s18] sm:$0xff] %v923_v30  ;;  %v921_v36 = vsel %vm918_vm11, %v920_v32, %v916_v34 }
 0x2b1   : > { %928 = vst [vmem:[%s351_s18 + $0x8] sm:$0xff] %v924_v33  ;;  %v926_v37 = vmul.f32 %v921_v36, %v1725_v43 }
 0x2b2   : > { %929 = vst [vmem:[%s351_s18 + $0x10] sm:$0xff] %v925_v35 }
 0x2b3   : > { %930 = vst [vmem:[%s351_s18 + $0x18] sm:$0xff] %v926_v37 }
 0x2b4   : > { %1268 = shalt.err (!%p1265_p3)
}
 0x2b5   : > { %s1308_s23 = smov 256   ;;  %s1309_s28 = smov 16  }
 0x2b6   : > { %1177 = dma.vmem_to_hbm [thread:$0]  (%p1398_p5), %s945_s16, 512, %s947_s17, %s932_s27, %s1308_s23, %s1308_s23, %s1309_s28  }
 0x2b7 PF: > { %p1183_p4 = scmp.ge.s32.totalorder %s1303_s12, 2  ;;  %s961_s29 = sand.u32 1, %s1291_s30  }
 0x2b8   : > { %s962_s18 = scalar_lea.sflag [#allocation4], %s961_s29 }
 0x2b9   : > { %p1180_p7 = pnand %p1183_p4, %p1402_p6 }
 0x2bb   : > { %p1181_p8 = pneg %p1180_p7 }
 0x2bd   : > { %1286 = dma.done.wait (%p1181_p8), %s962_s18, 512  }
 0x2be   : > { %1288 = vsyncadd (%p1181_p8), %s962_s18, 4294966784  ;;  %s1819_s26 = sld [smem:[#allocation6_spill]]  ;;  %p19_p9 = scmp.ge.s32.totalorder %s1385_s15, 4  }
 0x2bf   : > { %s1820_s30 = smov %s1295_s10  ;;  %s1821_s10 = smov %s1299_s11 }
 0x2c0   : > { %s1823_s12 = smov %s1385_s15  ;;  %21 = sbr.rel (!%p19_p9) target bundleno = 3 (0x3), region = 97 }
 0x2c4   : > { %s1822_s11 = smov %s1819_s26 }
 0x2c5   :  { %968 = vsyncpa [#allocation4], 1 }
 0x2c6   :  { %970 = vsyncpa [#allocation4 + $0x1], 1 }

</bundles_post_ra>
